<compile_context>
chip_gen: v7x
topology: tpu7x:2x2x1
jax: 0.10.0
libtpu: 0.0.40
codegen_flags: <defaults>
</compile_context>

<pallas_src>
import jax
import jax.numpy as jnp
from jax.experimental import pallas as pl
from jax.experimental.pallas import tpu as pltpu


def _round_up(x, m):
    return (x + m - 1) // m * m


def _cdiv(a, b):
    return (a + b - 1) // b


# ----------------------------------------------------------------------------
# Kernel: one (tm, tn) output tile, accumulated over the K grid axis.
# ----------------------------------------------------------------------------
def _fc_leakyrelu_kernel(x_ref, w_ref, b_ref, o_ref, acc_ref):
    k = pl.program_id(2)

    @pl.when(k == 0)
    def _():
        acc_ref[...] = jnp.zeros_like(acc_ref)

    # x_ref: (tm, tk), w_ref: (tk, tn) -> plain NN matmul; RHS contraction is
    # already on the sublane axis so the MXU consumes it with no transpose.
    acc_ref[...] += jnp.dot(x_ref[...], w_ref[...],
                            preferred_element_type=jnp.float32)

    @pl.when(k == pl.num_programs(2) - 1)
    def _():
        acc = acc_ref[...] + b_ref[...].astype(jnp.float32)   # (1, tn) broadcast
        # LeakyReLU(0.2): max(y, 0.2*y) is exact for 0 < slope < 1.
        o_ref[...] = jnp.maximum(acc, 0.2 * acc).astype(o_ref.dtype)


# ----------------------------------------------------------------------------
# VMEM budget / tile selection (generation aware).
# ----------------------------------------------------------------------------
def _vmem_budget_bytes():
    """Returns (tile_budget, vmem_limit) in bytes, derived from physical VMEM."""
    try:
        cap = pltpu.get_tpu_info().vmem_capacity_bytes
    except Exception:
        cap = 64 << 20  # conservative fallback (v7x-sized); safe everywhere
    # Keep the double-buffered working set well under the physical ceiling
    # (v7x: 64 MiB -> ~38 MiB; v5e/v6e: 128 MiB -> 48 MiB cap).
    budget = min(int(cap * 0.6), 48 << 20)
    # Raise the scoped VMEM limit above the 16/32 MiB defaults, with headroom.
    vmem_limit = min(int(cap * 0.75), budget + (16 << 20))
    return budget, vmem_limit


def _footprint(tm, tn, tk, x_it, w_it, o_it, w_bufs):
    """Approximate VMEM bytes for the pipelined working set."""
    return (2 * tm * tk * x_it          # x tiles (double-buffered)
            + w_bufs * tk * tn * w_it   # W tiles
            + 2 * tn * 4                # bias tiles
            + 2 * tm * tn * o_it        # output tiles
            + tm * tn * 4)              # f32 accumulator scratch


def _select_tiles(B, Cin, Cout, x_it, w_it, o_it, budget,
                  tm_max=512, tn_max=1024, tk_max=2048):
    sub = 8 if x_it >= 4 else 16        # sublane packing granule for the M axis

    # tm: balance M blocks so padded rows stay minimal (B=264 -> tm=136).
    n_m_blocks = max(1, _cdiv(B, tm_max))
    tm = min(_round_up(_cdiv(B, n_m_blocks), sub), _round_up(B, sub), tm_max)

    # tk / tn: lane-dense (>=128); take whole Cin / Cout when they fit.
    tk = min(_round_up(Cin, 128), tk_max)
    tn = min(_round_up(Cout, 128), tn_max)

    # Megacore: if M is a single block, keep >=2 blocks on N so both
    # TensorCores (v7x) get work.
    if _round_up(B, tm) // tm == 1 and Cout > 128:
        tn = min(tn, _round_up(_cdiv(Cout, 2), 128))

    # Shrink to fit the VMEM budget (reduce K first, then N, then M).
    while _footprint(tm, tn, tk, x_it, w_it, o_it, 2) > budget:
        if tk > 128:
            tk = max(128, tk // 2)
        elif tn > 128:
            tn = max(128, tn // 2)
        elif tm > sub:
            tm = max(sub, _round_up(tm // 2, sub))
        else:
            break
    return tm, tn, tk


# ----------------------------------------------------------------------------
# Wrapper.
# ----------------------------------------------------------------------------
def fc_block(x, weight, bias, *, compute_dtype=None):
    """Fused Linear + LeakyReLU(0.2).

    Args:
      x:      (B, Cin)    activations.
      weight: (Cout, Cin) PyTorch nn.Linear layout.
      bias:   (Cout,)
      compute_dtype: optional streaming dtype (e.g. jnp.bfloat16) for x/W;
        accumulation, bias add and activation stay in f32.
    Returns:
      (B, Cout) in x.dtype.
    """
    B, Cin = x.shape
    Cout, Cin_w = weight.shape
    assert Cin == Cin_w, "weight/input feature mismatch"

    out_dtype = x.dtype
    if compute_dtype is not None:
        x = x.astype(compute_dtype)
        weight = weight.astype(compute_dtype)

    x_it = x.dtype.itemsize
    w_it = weight.dtype.itemsize
    o_it = jnp.dtype(out_dtype).itemsize

    budget, vmem_limit = _vmem_budget_bytes()
    tm, tn, tk = _select_tiles(B, Cin, Cout, x_it, w_it, o_it, budget)

    Bp = _round_up(B, tm)
    Kp = _round_up(Cin, tk)
    Np = _round_up(Cout, tn)

    # One-time transpose to (Cin, Cout): RHS contraction lands on the sublane
    # axis, no per-K-step XLU transpose inside the kernel.
    wt = weight.T
    xp = x if (Bp == B and Kp == Cin) else jnp.pad(x, ((0, Bp - B), (0, Kp - Cin)))
    wp = wt if (Kp == Cin and Np == Cout) else jnp.pad(
        wt, ((0, Kp - Cin), (0, Np - Cout)))
    bp = bias if Np == Cout else jnp.pad(bias, (0, Np - Cout))
    bp2d = bp.reshape(1, Np).astype(jnp.float32)   # keep 2-D for TPU layout

    grid = (Bp // tm, Np // tn, Kp // tk)
    num_steps = grid[0] * grid[1] * grid[2]

    # Weight is the dominant DMA; when the K loop is short and there are
    # enough grid steps to pipeline, a 3rd weight buffer hides HBM jitter.
    w_spec = pl.BlockSpec((tk, tn), lambda i, j, k: (k, j))
    if (hasattr(pl, "Buffered") and grid[2] <= 2 and num_steps >= 3
            and _footprint(tm, tn, tk, x_it, w_it, o_it, 3) <= budget):
        try:
            w_spec = pl.BlockSpec((tk, tn), lambda i, j, k: (k, j),
                                  pipeline_mode=pl.Buffered(3))
        except TypeError:
            pass  # older BlockSpec signature; fall back to double buffering

    cost = pl.CostEstimate(
        flops=2 * B * Cin * Cout,
        transcendentals=0,
        bytes_accessed=(x.size * x_it
                        + weight.size * w_it
                        + bias.size * bias.dtype.itemsize
                        + B * Cout * o_it),
    )

    out_padded = pl.pallas_call(
        _fc_leakyrelu_kernel,
        out_shape=jax.ShapeDtypeStruct((Bp, Np), out_dtype),
        grid_spec=pltpu.PrefetchScalarGridSpec(
            num_scalar_prefetch=0,
            grid=grid,
            in_specs=[
                pl.BlockSpec((tm, tk), lambda i, j, k: (i, k)),   # x tile
                w_spec,                                           # W.T tile
                pl.BlockSpec((1, tn), lambda i, j, k: (0, j)),    # bias tile
            ],
            out_specs=pl.BlockSpec((tm, tn), lambda i, j, k: (i, j)),
            scratch_shapes=[pltpu.VMEM((tm, tn), jnp.float32)],
        ),
        compiler_params=pltpu.CompilerParams(
            dimension_semantics=("parallel", "parallel", "arbitrary"),
            vmem_limit_bytes=vmem_limit),
        cost_estimate=cost,
    )(xp, wp, bp2d)

    if Bp == B and Np == Cout:
        return out_padded
    return out_padded[:B, :Cout]


if __name__ == "__main__":
    # Shapes consistent with FCBlock(in_channels, out_channels) on a flat input.
    batch, in_channels, out_channels = 8, 32, 64

    key = jax.random.PRNGKey(0)
    kx, kw, kb = jax.random.split(key, 3)

    # Deterministic init mimicking nn.Linear's uniform(-1/sqrt(in), 1/sqrt(in)).
    bound = 1.0 / (in_channels ** 0.5)
    weight = jax.random.uniform(kw, (out_channels, in_channels),
                                minval=-bound, maxval=bound, dtype=jnp.float32)
    bias = jax.random.uniform(kb, (out_channels,),
                              minval=-bound, maxval=bound, dtype=jnp.float32)
    x = jax.random.normal(kx, (batch, in_channels), dtype=jnp.float32)

    out = fc_block(x, weight, bias)
    out = jax.block_until_ready(out)

    # Pure-JAX reference (Linear + LeakyReLU(0.2)).
    ref = x @ weight.T + bias
    ref = jnp.where(ref >= 0, ref, 0.2 * ref)
    assert out.shape == (batch, out_channels)
    assert jnp.allclose(out, ref, atol=1e-5, rtol=1e-5)

    print("KERNEL_OK")
</pallas_src>

<mosaic_0001>
module attributes {stable_mosaic.version = 11 : i64} {
  func.func @_fc_leakyrelu_kernel(%arg0: i32, %arg1: i32, %arg2: i32, %arg3: memref<8x128xf32, #tpu.memory_space<vmem>>, %arg4: memref<128x128xf32, #tpu.memory_space<vmem>>, %arg5: memref<1x128xf32, #tpu.memory_space<vmem>>, %arg6: memref<8x128xf32, #tpu.memory_space<vmem>>, %arg7: memref<8x128xf32, #tpu.memory_space<vmem>>) attributes {dimension_semantics = [#tpu.dimension_semantics<parallel>, #tpu.dimension_semantics<parallel>, #tpu.dimension_semantics<arbitrary>], iteration_bounds = array<i64: 1, 1, 1>, scalar_prefetch = 0 : i64, scratch_operands = 1 : i64, tpu.core_type = #tpu.core_type<tc>, window_params = [{transform_indices = @transform_0, window_bounds = array<i64: 8, 128>}, {transform_indices = @transform_1, window_bounds = array<i64: 128, 128>}, {transform_indices = @transform_2, window_bounds = array<i64: 1, 128>}, {transform_indices = @transform_3, window_bounds = array<i64: 8, 128>}]} {
    %c0_i32 = arith.constant 0 : i32
    %0 = arith.cmpi eq, %arg2, %c0_i32 : i32
    %1 = arith.extui %0 : i1 to i32
    %c0_i32_0 = arith.constant 0 : i32
    %2 = arith.cmpi ne, %1, %c0_i32_0 : i32
    scf.if %2 {
      %cst_10 = arith.constant 0.000000e+00 : f32
      %12 = vector.broadcast %cst_10 : f32 to vector<8x128xf32>
      %c0_11 = arith.constant 0 : index
      %c0_12 = arith.constant 0 : index
      %13 = vector.load %arg7[%c0_11, %c0_12] : memref<8x128xf32, #tpu.memory_space<vmem>>, vector<8x128xf32>
      tpu.vector_store %arg7[%c0_11, %c0_12], %12 {strides = array<i32>} : memref<8x128xf32, #tpu.memory_space<vmem>>, vector<8x128xf32>,
    } else {
    }
    %c0 = arith.constant 0 : index
    %c0_1 = arith.constant 0 : index
    %3 = vector.load %arg7[%c0, %c0_1] : memref<8x128xf32, #tpu.memory_space<vmem>>, vector<8x128xf32>
    %c0_2 = arith.constant 0 : index
    %c0_3 = arith.constant 0 : index
    %4 = vector.load %arg3[%c0_2, %c0_3] : memref<8x128xf32, #tpu.memory_space<vmem>>, vector<8x128xf32>
    %c0_4 = arith.constant 0 : index
    %c0_5 = arith.constant 0 : index
    %5 = vector.load %arg4[%c0_4, %c0_5] : memref<128x128xf32, #tpu.memory_space<vmem>>, vector<128x128xf32>
    %cst = arith.constant dense<0.000000e+00> : vector<8x128xf32>
    %6 = tpu.matmul %4, %5, %cst {dimension_numbers = #tpu.dot_dimension_numbers<[1], [0], [0], [1], [0, 0, 1, 1], [], []>} : vector<8x128xf32>, vector<128x128xf32>, vector<8x128xf32> -> vector<8x128xf32>
    %7 = arith.addf %3, %6 : vector<8x128xf32>
    %c0_6 = arith.constant 0 : index
    %c0_7 = arith.constant 0 : index
    %8 = vector.load %arg7[%c0_6, %c0_7] : memref<8x128xf32, #tpu.memory_space<vmem>>, vector<8x128xf32>
    tpu.vector_store %arg7[%c0_6, %c0_7], %7 {strides = array<i32>} : memref<8x128xf32, #tpu.memory_space<vmem>>, vector<8x128xf32>,
    %c0_i32_8 = arith.constant 0 : i32
    %9 = arith.cmpi eq, %arg2, %c0_i32_8 : i32
    %10 = arith.extui %9 : i1 to i32
    %c0_i32_9 = arith.constant 0 : i32
    %11 = arith.cmpi ne, %10, %c0_i32_9 : i32
    scf.if %11 {
      %c0_10 = arith.constant 0 : index
      %c0_11 = arith.constant 0 : index
      %12 = vector.load %arg7[%c0_10, %c0_11] : memref<8x128xf32, #tpu.memory_space<vmem>>, vector<8x128xf32>
      %c0_12 = arith.constant 0 : index
      %c0_13 = arith.constant 0 : index
      %13 = vector.load %arg5[%c0_12, %c0_13] : memref<1x128xf32, #tpu.memory_space<vmem>>, vector<1x128xf32>
      %14 = vector.broadcast %13 : vector<1x128xf32> to vector<8x128xf32>
      %15 = arith.addf %12, %14 : vector<8x128xf32>
      %cst_14 = arith.constant 2.000000e-01 : f32
      %16 = vector.broadcast %cst_14 : f32 to vector<8x128xf32>
      %17 = arith.mulf %16, %15 : vector<8x128xf32>
      %18 = arith.maximumf %15, %17 : vector<8x128xf32>
      %c0_15 = arith.constant 0 : index
      %c0_16 = arith.constant 0 : index
      %19 = vector.load %arg6[%c0_15, %c0_16] : memref<8x128xf32, #tpu.memory_space<vmem>>, vector<8x128xf32>
      tpu.vector_store %arg6[%c0_15, %c0_16], %18 {strides = array<i32>} : memref<8x128xf32, #tpu.memory_space<vmem>>, vector<8x128xf32>,
    } else {
    }
    return
  }
  func.func @transform_0(%arg0: i32, %arg1: i32, %arg2: i32) -> (i32, i32) {
    %c0_i32 = arith.constant 0 : i32
    return %arg0, %arg2 : i32, i32
  }
  func.func @transform_1(%arg0: i32, %arg1: i32, %arg2: i32) -> (i32, i32) {
    %c0_i32 = arith.constant 0 : i32
    return %arg2, %arg1 : i32, i32
  }
  func.func @transform_2(%arg0: i32, %arg1: i32, %arg2: i32) -> (i32, i32) {
    %c0_i32 = arith.constant 0 : i32
    %c0_i32_0 = arith.constant 0 : i32
    return %c0_i32, %arg1 : i32, i32
  }
  func.func @transform_3(%arg0: i32, %arg1: i32, %arg2: i32) -> (i32, i32) {
    %c0_i32 = arith.constant 0 : i32
    return %arg0, %arg1 : i32, i32
  }
}

</mosaic_0001>

<bundles_post_ra>
// kernel: tpu_custom_call.1
= control target key start
LH: loop header
LB: loop body
LE: loop exit
PB: predicated region body
PF: predicated region fallthrough
CT: control target
= control target key end

     0   :  { %8 = vsyncpa [#allocation4], 0  ;;  %s398_s0 = inlined_call_operand.hbm [shape: f32[8,128], index: 0, kind: input, shape index: {}]   ;;  %s399_s1 = inlined_call_operand.hbm [shape: f32[128,128], index: 1, kind: input, shape index: {}]   ;;  %s400_s2 = inlined_call_operand.vmem [shape: f32[1,128], index: 2, kind: input, shape index: {}]   ;;  %s401_s3 = inlined_call_operand.hbm [shape: f32[8,128], index: 3, kind: output, shape index: {}]  }
   0x1   :  { %9 = vsyncpa [#allocation7], 0 }
   0x2   :  { %10 = vsyncpa [#allocation5], 0  ;;  %s324_s12 = smov [#allocation3]   ;;  %s325_s14 = smov [#allocation6]  }
   0x3   :  { %s17_s13 = sshll.u32 %s324_s12, 4  ;;  %s26_s15 = sshll.u32 %s325_s14, 4  ;;  %s18_s13 = int_to_ptr.vmem [resolvable:$true] %s17_s13  ;;  %s352_s15 = int_to_ptr.vmem [resolvable:$true] %s26_s15 }
   0x4   :  { %s252_s18 = scalar_lea.hbm %s398_s0, 128 }
   0x5   :  { %p253_p0 = scmp.ne.s32.totalorder %s398_s0, %s252_s18  ;;  %p256_p1 = scmp.lt.u32.totalorder %s252_s18, %s398_s0 }
   0x7   :  { %p258_p2 = pnand %p256_p1, %p253_p0 }
   0x9   :  { %261 = shalt.err (!%p258_p2)
}
   0xa   :  { %s262_s23 = scalar_lea.vmem %s18_s13, 128  ;;  %p267_p4 = scmp.lt.s32.totalorder %s18_s13, %s18_s13 }
   0xb   :  { %p263_p3 = scmp.ne.s32.totalorder %s18_s13, %s262_s23  ;;  %p268_p5 = scmp.lt.s32.totalorder %s262_s23, %s262_s23 }
   0xd   :  { %p269_p6 = por %p268_p5, %p267_p4 }
   0xf   :  { %p270_p7 = pnand %p269_p6, %p263_p3 }
  0x11   :  { %273 = shalt.err (!%p270_p7)
}
  0x12   :  { %20 = dma.hbm_to_vmem [thread:$0]  %s398_s0, 128, %s18_s13, [#allocation4]  }
  0x13   :  { %s274_s28 = scalar_lea.hbm %s399_s1, 2048 }
  0x14   :  { %p275_p8 = scmp.ne.s32.totalorder %s399_s1, %s274_s28  ;;  %p278_p9 = scmp.lt.u32.totalorder %s274_s28, %s399_s1 }
  0x16   :  { %p280_p10 = pnand %p278_p9, %p275_p8 }
  0x18   :  { %283 = shalt.err (!%p280_p10)
}
  0x19   :  { %s284_s6 = scalar_lea.vmem %s352_s15, 2048  ;;  %p289_p12 = scmp.lt.s32.totalorder %s352_s15, %s352_s15 }
  0x1a   :  { %p285_p11 = scmp.ne.s32.totalorder %s352_s15, %s284_s6  ;;  %p290_p13 = scmp.lt.s32.totalorder %s284_s6, %s284_s6 }
  0x1c   :  { %p291_p0 = por %p290_p13, %p289_p12 }
  0x1e   :  { %p292_p1 = pnand %p291_p0, %p285_p11 }
  0x20   :  { %295 = shalt.err (!%p292_p1)
}
  0x21   :  { %s326_s0 = smov 128   ;;  %s327_s7 = smov 8  }
  0x22   :  { %32 = dma.hbm_to_vmem [thread:$0]  %s399_s1, 2048, %s352_s15, [#allocation7], %s326_s0, %s326_s0, %s327_s7  }
  0x23   :  { %318 = dma.done.wait [#allocation4], 128  }
  0x24   :  { %319 = vsyncadd [#allocation4], 4294967168 }
  0x25   :  { %320 = dma.done.wait [#allocation7], 2048  }
  0x26   :  { %321 = vsyncadd [#allocation7], 4294965248  ;;  %v328_v0 = vmov 0.0|0.0   ;;  %vm329_vm0 = vmmov 0   ;;  %v330_v1 = vmov 0.0   ;;  %v48_v2 = vld [vmem:[#allocation6] sm:$0xff] }
  0x27   :  { %220 = vmatprep.subr.bf16.mxu0 %v328_v0  ;;  %217 = vmatprep.mubr.msk.f32.mxu0 %vm329_vm0, %v330_v1  ;;  %v49_v3 = vld [vmem:[#allocation6 + $0x8] sm:$0xff]  ;;  %v50_v4 = vld [vmem:[#allocation6 + $0x10] sm:$0xff]  ;;  %v51_v6 = vld [vmem:[#allocation6 + $0x18] sm:$0xff]  ;;  %s331_s11 = smov [#allocation8]  }
  0x28   :  { %v221_v5 = vpack.c.bf16 %v49_v3, %v48_v2  ;;  %v224_v7 = vpack.c.bf16 %v51_v6, %v50_v4  ;;  %v52_v8 = vld [vmem:[#allocation6 + $0x20] sm:$0xff]  ;;  %v53_v9 = vld [vmem:[#allocation6 + $0x28] sm:$0xff]  ;;  %v54_v11 = vld [vmem:[#allocation6 + $0x30] sm:$0xff]  ;;  %s157_s12 = sshll.u32 %s331_s11, 4  ;;  %s158_s12 = int_to_ptr.vmem [resolvable:$true] %s157_s12 }
  0x29   :  { %v227_v10 = vpack.c.bf16 %v53_v9, %v52_v8  ;;  %v55_v12 = vld [vmem:[#allocation6 + $0x38] sm:$0xff]  ;;  %v56_v14 = vld [vmem:[#allocation6 + $0x40] sm:$0xff]  ;;  %v57_v15 = vld [vmem:[#allocation6 + $0x48] sm:$0xff]  ;;  %s296_s13 = scalar_lea.vmem %s158_s12, 128  ;;  %p301_p3 = scmp.lt.s32.totalorder %s158_s12, %s158_s12 }
  0x2a   :  { %222 = vmatpush3.bf16.msra.mxu0 %v221_v5  ;;  %v230_v13 = vpack.c.bf16 %v55_v12, %v54_v11  ;;  %v233_v16 = vpack.c.bf16 %v57_v15, %v56_v14  ;;  %v58_v17 = vld [vmem:[#allocation6 + $0x50] sm:$0xff]  ;;  %v59_v18 = vld [vmem:[#allocation6 + $0x58] sm:$0xff]  ;;  %v60_v20 = vld [vmem:[#allocation6 + $0x60] sm:$0xff]  ;;  %p297_p2 = scmp.ne.s32.totalorder %s158_s12, %s296_s13  ;;  %p302_p4 = scmp.lt.s32.totalorder %s296_s13, %s296_s13 }
  0x2b   :  { %223 = vmatprep.subr.bf16.mxu0 %v328_v0  ;;  %v236_v19 = vpack.c.bf16 %v59_v18, %v58_v17  ;;  %v61_v21 = vld [vmem:[#allocation6 + $0x68] sm:$0xff]  ;;  %v62_v23 = vld [vmem:[#allocation6 + $0x70] sm:$0xff]  ;;  %v63_v24 = vld [vmem:[#allocation6 + $0x78] sm:$0xff] }
  0x2c   :  { %v239_v22 = vpack.c.bf16 %v61_v21, %v60_v20  ;;  %v242_v25 = vpack.c.bf16 %v63_v24, %v62_v23  ;;  %v47_v26 = vld [vmem:[#allocation3] sm:$0xff]  ;;  %p303_p5 = por %p302_p4, %p301_p3 }
  0x2d   :  { %v167_v27 = vld [vmem:[%s400_s2] ss:$0 sm:$0xff] }
  0x2e   :  { %225 = vmatpush3.bf16.msra.mxu0 %v224_v7  ;;  %p304_p6 = pnand %p303_p5, %p297_p2 }
  0x2f   :  { %226 = vmatprep.subr.bf16.mxu0 %v328_v0 }
  0x32   :  { %228 = vmatpush3.bf16.msra.mxu0 %v227_v10 }
  0x33   :  { %229 = vmatprep.subr.bf16.mxu0 %v328_v0 }
  0x36   :  { %231 = vmatpush3.bf16.msra.mxu0 %v230_v13 }
  0x37   :  { %232 = vmatprep.subr.bf16.mxu0 %v328_v0 }
  0x3a   :  { %234 = vmatpush3.bf16.msra.mxu0 %v233_v16 }
  0x3b   :  { %235 = vmatprep.subr.bf16.mxu0 %v328_v0 }
  0x3e   :  { %237 = vmatpush3.bf16.msra.mxu0 %v236_v19 }
  0x3f   :  { %238 = vmatprep.subr.bf16.mxu0 %v328_v0 }
  0x42   :  { %240 = vmatpush3.bf16.msra.mxu0 %v239_v22 }
  0x43   :  { %241 = vmatprep.subr.bf16.mxu0 %v328_v0 }
  0x46   :  { %243 = vmatpush3.bf16.msra.mxu0 %v242_v25 }
  0x49   :  { %218 = vmatmul.mubr.f32.vlgmr.msra.gmra.mrb[0].mxu0 %v47_v26 }
 0x11c   :  { %v130_v28 = vpop.f32.mrb[0].mxu0 }
 0x11d   :  { %v147_v29 = vadd.f32 %v167_v27, %v130_v28  ;;  %v219_v30 = vpop.f32.mrb[1].mxu0 }
 0x11f   :  { %v148_v31 = vmul.f32 0.2, %v147_v29 }
 0x121   :  { %v149_v32 = vmax.f32 %v147_v29, %v148_v31 }
 0x123   :  { %150 = vst [vmem:[#allocation8] sm:$0xff] %v149_v32 }
 0x124   :  { %307 = shalt.err (!%p304_p6)
}
 0x125   :  { %s308_s2 = scalar_lea.hbm %s401_s3, 128 }
 0x126   :  { %p309_p7 = scmp.ne.s32.totalorder %s401_s3, %s308_s2  ;;  %p312_p8 = scmp.lt.u32.totalorder %s308_s2, %s401_s3 }
 0x128   :  { %p314_p9 = pnand %p312_p8, %p309_p7 }
 0x12a   :  { %317 = shalt.err (!%p314_p9)
}
 0x12b   :  { %160 = dma.vmem_to_hbm [thread:$0]  %s158_s12, 128, %s401_s3, [#allocation5]  }
 0x12c   :  { %322 = dma.done.wait [#allocation5], 128  }
 0x12d   :  { %323 = vsyncadd [#allocation5], 4294967168 }
 0x12e   :  { %164 = vsyncpa [#allocation4], 1 }
 0x12f   :  { %165 = vsyncpa [#allocation7], 1 }
 0x130   :  { %166 = vsyncpa [#allocation5], 1 }

</bundles_post_ra>
